<compile_context>
chip_gen: v6e
topology: v6e:2x2x1
jax: 0.10.0
libtpu: 0.0.40
codegen_flags: <defaults>
</compile_context>

<pallas_src>
import jax
import jax.numpy as jnp
from jax.experimental import pallas as pl
from jax.experimental.pallas import tpu as pltpu

_MIB = 1024 * 1024


def _vmem_capacity_bytes():
    """Trace-time VMEM capacity query with a conservative fallback."""
    try:
        info = pltpu.get_tpu_info()
        cap = getattr(info, "vmem_capacity_bytes", None)
        if cap:
            return int(cap)
    except Exception:
        pass
    return 64 * _MIB  # conservative (v7x per-TC size)


def _largest_divisor_leq(n, cap):
    cap = max(1, min(int(n), int(cap)))
    for d in range(cap, 0, -1):
        if n % d == 0:
            return d
    return 1


def channel_attention(x, w1, w2, *, target_tile_bytes=4 * _MIB, max_hw_tile=None):
    """SE/CBAM channel attention.

    x:  (B, C, H, W)   input feature map (float dtype; accumulation is f32)
    w1: (C//r, C)      fc1 1x1-conv weight (kernel dims squeezed)
    w2: (C, C//r)      fc2 1x1-conv weight (kernel dims squeezed)
    Returns sigmoid(fc2(relu(fc1(avgpool(x)))) + fc2(relu(fc1(maxpool(x)))))
    with shape (B, C, 1, 1), matching the PyTorch module.
    max_hw_tile: optional explicit lane cap (mainly for testing the multi-tile
    / ragged-mask path); default tiling is sized by bytes.
    """
    B, C, H, W = x.shape
    HW = H * W
    hid = w1.shape[0]
    xr = x.reshape(B, C, HW)
    itemsize = jnp.dtype(x.dtype).itemsize
    inv_hw = 1.0 / float(HW)

    # ---- generation-gated VMEM budgets -------------------------------------
    vmem_cap = _vmem_capacity_bytes()
    if vmem_cap >= 96 * _MIB:          # v5e / v6e (128 MiB physical)
        tile_budget = 32 * _MIB        # double-buffered x footprint cap
        vmem_limit = 64 * _MIB
    else:                              # v7x (64 MiB physical per TC)
        tile_budget = 24 * _MIB
        vmem_limit = 48 * _MIB

    per_batch_bytes = C * HW * itemsize
    row_bytes = C * itemsize
    lanes_budget = max(128, ((tile_budget // 2) // row_bytes) // 128 * 128)

    # ---- choose (B_blk, t_hw): size grid steps by BYTES --------------------
    if max_hw_tile is not None:
        # Explicit lane cap: one batch element per step (test / override path).
        B_blk = 1
        t_hw = max(128, (int(max_hw_tile) // 128) * 128)
        t_hw = int(min(t_hw, lanes_budget))
        if HW <= t_hw:
            t_hw = HW
    elif per_batch_bytes >= target_tile_bytes:
        # Large feature map: tile the spatial axis, ~target bytes per step.
        B_blk = 1
        lanes_target = -(-int(target_tile_bytes) // row_bytes)
        lanes_target = max(128, ((lanes_target + 127) // 128) * 128)
        t_hw = int(min(lanes_target, lanes_budget))
        if HW <= t_hw:
            t_hw = HW
    else:
        # Small feature map: take the whole HW and fold batch elements into the
        # sublane dim so each step still moves a multi-MiB slab.
        t_hw = HW
        cap_by_mem = max(1, (tile_budget // 2) // per_batch_bytes)
        want = max(1, -(-int(target_tile_bytes) // per_batch_bytes))
        # 64 caps the (fully unrolled) finalize MLP loop; still >= 2 MiB/step
        # for any realistic C.
        B_blk = _largest_divisor_leq(B, min(cap_by_mem, want, 64))

    num_k = -(-HW // t_hw)
    needs_mask = (HW % t_hw) != 0
    num_g = B // B_blk

    def kernel(x_ref, w1_ref, w2_ref, o_ref, pool_sc):
        # x_ref:  (B_blk, C, t_hw)  one spatial slab of B_blk batch elements
        # w1_ref: (hid, C), w2_ref: (C, hid)
        # o_ref:  (B_blk, C, 1)
        # pool_sc:(B_blk, C, 2) f32; col 0 = running RAW sum, col 1 = running max
        k = pl.program_id(1)
        nk = pl.num_programs(1)

        @pl.when(k == 0)
        def _init():
            pool_sc[:, :, 0:1] = jnp.zeros((B_blk, C, 1), jnp.float32)
            pool_sc[:, :, 1:2] = jnp.full((B_blk, C, 1), -jnp.inf, jnp.float32)

        xv = x_ref[...]  # native dtype; no full-tile f32 upcast

        def accumulate(x_sum_in, x_max_in):
            tile_sum = jnp.sum(x_sum_in, axis=2, keepdims=True,
                               dtype=jnp.float32)                    # (B_blk,C,1)
            tile_max = jnp.max(x_max_in, axis=2,
                               keepdims=True).astype(jnp.float32)    # (B_blk,C,1)
            pool_sc[:, :, 0:1] = pool_sc[:, :, 0:1] + tile_sum       # raw sum
            pool_sc[:, :, 1:2] = jnp.maximum(pool_sc[:, :, 1:2], tile_max)

        if needs_mask:
            # Only the ragged last tile pays the iota/compare/select cost.
            @pl.when(k != nk - 1)
            def _steady():
                accumulate(xv, xv)

            @pl.when(k == nk - 1)
            def _ragged():
                col = jax.lax.broadcasted_iota(jnp.int32, xv.shape, 2)
                valid = (k * t_hw + col) < HW
                accumulate(jnp.where(valid, xv, jnp.zeros_like(xv)),
                           jnp.where(valid, xv, jnp.full_like(xv, -jnp.inf)))
        else:
            accumulate(xv, xv)

        @pl.when(k == nk - 1)
        def _finalize():
            # Apply the mean scale ONCE (raw sum -> mean).
            pool_sc[:, :, 0:1] = pool_sc[:, :, 0:1] * inv_hw
            w1v = w1_ref[...].astype(jnp.float32)                    # (hid, C)
            w2v = w2_ref[...].astype(jnp.float32)                    # (C, hid)
            for bi in range(B_blk):  # static, small; tiny finalize matmuls
                pooled = pool_sc[bi]                                 # (C, 2)
                h = jnp.maximum(
                    jnp.dot(w1v, pooled, preferred_element_type=jnp.float32),
                    0.0)                                             # (hid, 2)
                branches = jnp.dot(w2v, h,
                                   preferred_element_type=jnp.float32)  # (C, 2)
                gate = branches[:, 0:1] + branches[:, 1:2]           # (C, 1)
                o_ref[bi] = jax.nn.sigmoid(gate).astype(o_ref.dtype)

    out = pl.pallas_call(
        kernel,
        out_shape=jax.ShapeDtypeStruct((B, C, 1), x.dtype),
        grid_spec=pltpu.PrefetchScalarGridSpec(
            num_scalar_prefetch=0,
            grid=(num_g, num_k),
            in_specs=[
                # one (B_blk, C, t_hw) slab per step
                pl.BlockSpec((B_blk, C, t_hw), lambda g, k: (g, 0, k)),
                # weights resident (tiny)
                pl.BlockSpec((hid, C), lambda g, k: (0, 0)),
                pl.BlockSpec((C, hid), lambda g, k: (0, 0)),
            ],
            out_specs=pl.BlockSpec((B_blk, C, 1), lambda g, k: (g, 0, 0)),
            scratch_shapes=[pltpu.VMEM((B_blk, C, 2), jnp.float32)],
        ),
        compiler_params=pltpu.CompilerParams(
            dimension_semantics=("parallel", "arbitrary"),
            vmem_limit_bytes=vmem_limit,
        ),
    )(xr, w1, w2)
    return out.reshape(B, C, 1, 1)


def reference_channel_attention(x, w1, w2):
    """Pure-JAX reference mirroring the PyTorch forward."""
    avg = jnp.mean(x, axis=(2, 3))                      # (B, C)
    mx = jnp.max(x, axis=(2, 3))                        # (B, C)

    def mlp(v):
        h = jnp.maximum(v @ w1.T, 0.0)                  # (B, C//r)
        return h @ w2.T                                 # (B, C)

    out = jax.nn.sigmoid(mlp(avg) + mlp(mx))
    return out[:, :, None, None]


if __name__ == "__main__":
    # Small shapes consistent with the module: ratio=16 -> hidden = C // 16.
    B, C, H, W = 2, 32, 16, 16
    ratio = 16
    hid = C // ratio

    key = jax.random.PRNGKey(0)
    kx, k1, k2, kx2 = jax.random.split(key, 4)

    x = jax.random.normal(kx, (B, C, H, W), dtype=jnp.float32)
    # Conv2d(C, C//r, 1) / Conv2d(C//r, C, 1) weights with 1x1 kernel dims squeezed.
    w1 = jax.random.normal(k1, (hid, C), dtype=jnp.float32) * (1.0 / jnp.sqrt(C))
    w2 = jax.random.normal(k2, (C, hid), dtype=jnp.float32) * (1.0 / jnp.sqrt(hid))

    # 1) Default path: small per-batch maps -> batch folding (B_blk=2, one step).
    out = jax.block_until_ready(channel_attention(x, w1, w2))
    ref = reference_channel_attention(x, w1, w2)
    assert out.shape == (B, C, 1, 1)
    assert jnp.allclose(out, ref, atol=1e-5, rtol=1e-5)

    # 2) Multi-tile path, no mask: HW=256 split into two 128-wide tiles.
    out_mt = jax.block_until_ready(channel_attention(x, w1, w2, max_hw_tile=128))
    assert jnp.allclose(out_mt, ref, atol=1e-5, rtol=1e-5)

    # 3) Multi-tile path with a ragged (masked) last tile: HW=324, 128-wide tiles.
    x2 = jax.random.normal(kx2, (B, C, 18, 18), dtype=jnp.float32)
    out2 = jax.block_until_ready(channel_attention(x2, w1, w2, max_hw_tile=128))
    ref2 = reference_channel_attention(x2, w1, w2)
    assert out2.shape == (B, C, 1, 1)
    assert jnp.allclose(out2, ref2, atol=1e-5, rtol=1e-5)

    print("KERNEL_OK")
</pallas_src>

<mosaic_0001>
module attributes {stable_mosaic.version = 11 : i64} {
  func.func @kernel(%arg0: i32, %arg1: i32, %arg2: memref<2x32x256xf32, #tpu.memory_space<vmem>>, %arg3: memref<2x32xf32, #tpu.memory_space<vmem>>, %arg4: memref<32x2xf32, #tpu.memory_space<vmem>>, %arg5: memref<2x32x1xf32, #tpu.memory_space<vmem>>, %arg6: memref<2x32x2xf32, #tpu.memory_space<vmem>>) attributes {dimension_semantics = [#tpu.dimension_semantics<parallel>, #tpu.dimension_semantics<arbitrary>], iteration_bounds = array<i64: 1, 1>, scalar_prefetch = 0 : i64, scratch_operands = 1 : i64, tpu.core_type = #tpu.core_type<tc>, window_params = [{transform_indices = @transform_0, window_bounds = array<i64: 2, 32, 256>}, {pipeline_mode = #tpu.pipeline_mode<synchronous>, transform_indices = @transform_1, window_bounds = array<i64: 2, 32>}, {pipeline_mode = #tpu.pipeline_mode<synchronous>, transform_indices = @transform_2, window_bounds = array<i64: 32, 2>}, {transform_indices = @transform_3, window_bounds = array<i64: 2, 32, 1>}]} {
    %c0_i32 = arith.constant 0 : i32
    %0 = arith.cmpi eq, %arg1, %c0_i32 : i32
    %1 = arith.extui %0 : i1 to i32
    %c0_i32_0 = arith.constant 0 : i32
    %2 = arith.cmpi ne, %1, %c0_i32_0 : i32
    scf.if %2 {
      %cst_17 = arith.constant 0.000000e+00 : f32
      %17 = vector.broadcast %cst_17 : f32 to vector<2x32x1xf32>
      %c0_18 = arith.constant 0 : index
      %c0_19 = arith.constant 0 : index
      %c0_20 = arith.constant 0 : index
      %18 = vector.load %arg6[%c0_18, %c0_19, %c0_20] : memref<2x32x2xf32, #tpu.memory_space<vmem>>, vector<2x32x1xf32>
      tpu.vector_store %arg6[%c0_18, %c0_19, %c0_20], %17 {strides = array<i32>} : memref<2x32x2xf32, #tpu.memory_space<vmem>>, vector<2x32x1xf32>,
      %cst_21 = arith.constant 0xFF800000 : f32
      %19 = vector.broadcast %cst_21 : f32 to vector<2x32x1xf32>
      %c0_22 = arith.constant 0 : index
      %c0_23 = arith.constant 0 : index
      %c1_24 = arith.constant 1 : index
      %20 = vector.load %arg6[%c0_22, %c0_23, %c1_24] : memref<2x32x2xf32, #tpu.memory_space<vmem>>, vector<2x32x1xf32>
      tpu.vector_store %arg6[%c0_22, %c0_23, %c1_24], %19 {strides = array<i32>} : memref<2x32x2xf32, #tpu.memory_space<vmem>>, vector<2x32x1xf32>,
    } else {
    }
    %c0 = arith.constant 0 : index
    %c0_1 = arith.constant 0 : index
    %c0_2 = arith.constant 0 : index
    %3 = vector.load %arg2[%c0, %c0_1, %c0_2] : memref<2x32x256xf32, #tpu.memory_space<vmem>>, vector<2x32x256xf32>
    %cst = arith.constant dense<0.000000e+00> : vector<2x32xf32>
    %4 = vector.multi_reduction <add>, %3, %cst [2] : vector<2x32x256xf32> to vector<2x32xf32>
    %5 = vector.shape_cast %4 : vector<2x32xf32> to vector<2x32x1xf32>
    %cst_3 = arith.constant dense<0xFF800000> : vector<2x32xf32>
    %6 = vector.multi_reduction <maximumf>, %3, %cst_3 [2] : vector<2x32x256xf32> to vector<2x32xf32>
    %7 = vector.shape_cast %6 : vector<2x32xf32> to vector<2x32x1xf32>
    %c0_4 = arith.constant 0 : index
    %c0_5 = arith.constant 0 : index
    %c0_6 = arith.constant 0 : index
    %8 = vector.load %arg6[%c0_4, %c0_5, %c0_6] : memref<2x32x2xf32, #tpu.memory_space<vmem>>, vector<2x32x1xf32>
    %9 = arith.addf %8, %5 : vector<2x32x1xf32>
    %c0_7 = arith.constant 0 : index
    %c0_8 = arith.constant 0 : index
    %c0_9 = arith.constant 0 : index
    %10 = vector.load %arg6[%c0_7, %c0_8, %c0_9] : memref<2x32x2xf32, #tpu.memory_space<vmem>>, vector<2x32x1xf32>
    tpu.vector_store %arg6[%c0_7, %c0_8, %c0_9], %9 {strides = array<i32>} : memref<2x32x2xf32, #tpu.memory_space<vmem>>, vector<2x32x1xf32>,
    %c0_10 = arith.constant 0 : index
    %c0_11 = arith.constant 0 : index
    %c1 = arith.constant 1 : index
    %11 = vector.load %arg6[%c0_10, %c0_11, %c1] : memref<2x32x2xf32, #tpu.memory_space<vmem>>, vector<2x32x1xf32>
    %12 = arith.maximumf %11, %7 : vector<2x32x1xf32>
    %c0_12 = arith.constant 0 : index
    %c0_13 = arith.constant 0 : index
    %c1_14 = arith.constant 1 : index
    %13 = vector.load %arg6[%c0_12, %c0_13, %c1_14] : memref<2x32x2xf32, #tpu.memory_space<vmem>>, vector<2x32x1xf32>
    tpu.vector_store %arg6[%c0_12, %c0_13, %c1_14], %12 {strides = array<i32>} : memref<2x32x2xf32, #tpu.memory_space<vmem>>, vector<2x32x1xf32>,
    %c0_i32_15 = arith.constant 0 : i32
    %14 = arith.cmpi eq, %arg1, %c0_i32_15 : i32
    %15 = arith.extui %14 : i1 to i32
    %c0_i32_16 = arith.constant 0 : i32
    %16 = arith.cmpi ne, %15, %c0_i32_16 : i32
    scf.if %16 {
      %c0_17 = arith.constant 0 : index
      %c0_18 = arith.constant 0 : index
      %c0_19 = arith.constant 0 : index
      %17 = vector.load %arg6[%c0_17, %c0_18, %c0_19] : memref<2x32x2xf32, #tpu.memory_space<vmem>>, vector<2x32x1xf32>
      %cst_20 = arith.constant 3.906250e-03 : f32
      %18 = vector.broadcast %cst_20 : f32 to vector<2x32x1xf32>
      %19 = arith.mulf %17, %18 : vector<2x32x1xf32>
      %c0_21 = arith.constant 0 : index
      %c0_22 = arith.constant 0 : index
      %c0_23 = arith.constant 0 : index
      %20 = vector.load %arg6[%c0_21, %c0_22, %c0_23] : memref<2x32x2xf32, #tpu.memory_space<vmem>>, vector<2x32x1xf32>
      tpu.vector_store %arg6[%c0_21, %c0_22, %c0_23], %19 {strides = array<i32>} : memref<2x32x2xf32, #tpu.memory_space<vmem>>, vector<2x32x1xf32>,
      %c0_24 = arith.constant 0 : index
      %c0_25 = arith.constant 0 : index
      %21 = vector.load %arg3[%c0_24, %c0_25] : memref<2x32xf32, #tpu.memory_space<vmem>>, vector<2x32xf32>
      %c0_26 = arith.constant 0 : index
      %c0_27 = arith.constant 0 : index
      %22 = vector.load %arg4[%c0_26, %c0_27] : memref<32x2xf32, #tpu.memory_space<vmem>>, vector<32x2xf32>
      %c0_28 = arith.constant 0 : index
      %c0_29 = arith.constant 0 : index
      %c0_30 = arith.constant 0 : index
      %23 = vector.load %arg6[%c0_28, %c0_29, %c0_30] : memref<2x32x2xf32, #tpu.memory_space<vmem>>, vector<1x32x2xf32>
      %24 = vector.shape_cast %23 : vector<1x32x2xf32> to vector<32x2xf32>
      %cst_31 = arith.constant dense<0.000000e+00> : vector<2x2xf32>
      %25 = tpu.matmul %21, %24, %cst_31 {dimension_numbers = #tpu.dot_dimension_numbers<[1], [0], [0], [1], [0, 0, 1, 1], [], []>} : vector<2x32xf32>, vector<32x2xf32>, vector<2x2xf32> -> vector<2x2xf32>
      %cst_32 = arith.constant 0.000000e+00 : f32
      %26 = vector.broadcast %cst_32 : f32 to vector<2x2xf32>
      %27 = arith.maximumf %25, %26 : vector<2x2xf32>
      %cst_33 = arith.constant dense<0.000000e+00> : vector<32x2xf32>
      %28 = tpu.matmul %22, %27, %cst_33 {dimension_numbers = #tpu.dot_dimension_numbers<[1], [0], [0], [1], [0, 0, 1, 1], [], []>} : vector<32x2xf32>, vector<2x2xf32>, vector<32x2xf32> -> vector<32x2xf32>
      %29 = vector.extract_strided_slice %28 {offsets = [0, 0], sizes = [32, 1], strides = [1, 1]} : vector<32x2xf32> to vector<32x1xf32>
      %30 = vector.extract_strided_slice %28 {offsets = [0, 1], sizes = [32, 1], strides = [1, 1]} : vector<32x2xf32> to vector<32x1xf32>
      %31 = arith.addf %29, %30 : vector<32x1xf32>
      %32 = arith.negf %31 : vector<32x1xf32>
      %33 = math.exp %32 : vector<32x1xf32>
      %cst_34 = arith.constant 1.000000e+00 : f32
      %34 = vector.broadcast %cst_34 : f32 to vector<32x1xf32>
      %35 = arith.addf %34, %33 : vector<32x1xf32>
      %36 = arith.divf %34, %35 : vector<32x1xf32>
      %c0_35 = arith.constant 0 : index
      %c0_36 = arith.constant 0 : index
      %c0_37 = arith.constant 0 : index
      %37 = vector.load %arg5[%c0_35, %c0_36, %c0_37] : memref<2x32x1xf32, #tpu.memory_space<vmem>>, vector<1x32x1xf32>
      %38 = vector.shape_cast %37 : vector<1x32x1xf32> to vector<32x1xf32>
      %39 = vector.shape_cast %36 : vector<32x1xf32> to vector<1x32x1xf32>
      tpu.vector_store %arg5[%c0_35, %c0_36, %c0_37], %39 {strides = array<i32>} : memref<2x32x1xf32, #tpu.memory_space<vmem>>, vector<1x32x1xf32>,
      %c1_38 = arith.constant 1 : index
      %c0_39 = arith.constant 0 : index
      %c0_40 = arith.constant 0 : index
      %40 = vector.load %arg6[%c1_38, %c0_39, %c0_40] : memref<2x32x2xf32, #tpu.memory_space<vmem>>, vector<1x32x2xf32>
      %41 = vector.shape_cast %40 : vector<1x32x2xf32> to vector<32x2xf32>
      %cst_41 = arith.constant dense<0.000000e+00> : vector<2x2xf32>
      %42 = tpu.matmul %21, %41, %cst_41 {dimension_numbers = #tpu.dot_dimension_numbers<[1], [0], [0], [1], [0, 0, 1, 1], [], []>} : vector<2x32xf32>, vector<32x2xf32>, vector<2x2xf32> -> vector<2x2xf32>
      %cst_42 = arith.constant 0.000000e+00 : f32
      %43 = vector.broadcast %cst_42 : f32 to vector<2x2xf32>
      %44 = arith.maximumf %42, %43 : vector<2x2xf32>
      %cst_43 = arith.constant dense<0.000000e+00> : vector<32x2xf32>
      %45 = tpu.matmul %22, %44, %cst_43 {dimension_numbers = #tpu.dot_dimension_numbers<[1], [0], [0], [1], [0, 0, 1, 1], [], []>} : vector<32x2xf32>, vector<2x2xf32>, vector<32x2xf32> -> vector<32x2xf32>
      %46 = vector.extract_strided_slice %45 {offsets = [0, 0], sizes = [32, 1], strides = [1, 1]} : vector<32x2xf32> to vector<32x1xf32>
      %47 = vector.extract_strided_slice %45 {offsets = [0, 1], sizes = [32, 1], strides = [1, 1]} : vector<32x2xf32> to vector<32x1xf32>
      %48 = arith.addf %46, %47 : vector<32x1xf32>
      %49 = arith.negf %48 : vector<32x1xf32>
      %50 = math.exp %49 : vector<32x1xf32>
      %cst_44 = arith.constant 1.000000e+00 : f32
      %51 = vector.broadcast %cst_44 : f32 to vector<32x1xf32>
      %52 = arith.addf %51, %50 : vector<32x1xf32>
      %53 = arith.divf %51, %52 : vector<32x1xf32>
      %c1_45 = arith.constant 1 : index
      %c0_46 = arith.constant 0 : index
      %c0_47 = arith.constant 0 : index
      %54 = vector.load %arg5[%c1_45, %c0_46, %c0_47] : memref<2x32x1xf32, #tpu.memory_space<vmem>>, vector<1x32x1xf32>
      %55 = vector.shape_cast %54 : vector<1x32x1xf32> to vector<32x1xf32>
      %56 = vector.shape_cast %53 : vector<32x1xf32> to vector<1x32x1xf32>
      tpu.vector_store %arg5[%c1_45, %c0_46, %c0_47], %56 {strides = array<i32>} : memref<2x32x1xf32, #tpu.memory_space<vmem>>, vector<1x32x1xf32>,
    } else {
    }
    return
  }
  func.func @transform_0(%arg0: i32, %arg1: i32) -> (i32, i32, i32) {
    %c0_i32 = arith.constant 0 : i32
    %c0_i32_0 = arith.constant 0 : i32
    return %arg0, %c0_i32, %arg1 : i32, i32, i32
  }
  func.func @transform_1(%arg0: i32, %arg1: i32) -> (i32, i32) {
    %c0_i32 = arith.constant 0 : i32
    %c0_i32_0 = arith.constant 0 : i32
    %c0_i32_1 = arith.constant 0 : i32
    return %c0_i32, %c0_i32_0 : i32, i32
  }
  func.func @transform_2(%arg0: i32, %arg1: i32) -> (i32, i32) {
    %c0_i32 = arith.constant 0 : i32
    %c0_i32_0 = arith.constant 0 : i32
    %c0_i32_1 = arith.constant 0 : i32
    return %c0_i32, %c0_i32_0 : i32, i32
  }
  func.func @transform_3(%arg0: i32, %arg1: i32) -> (i32, i32, i32) {
    %c0_i32 = arith.constant 0 : i32
    %c0_i32_0 = arith.constant 0 : i32
    %c0_i32_1 = arith.constant 0 : i32
    return %arg0, %c0_i32, %c0_i32_0 : i32, i32, i32
  }
}

</mosaic_0001>

<bundles_post_ra>
// kernel: tpu_custom_call.1
= control target key start
LH: loop header
LB: loop body
LE: loop exit
PB: predicated region body
PF: predicated region fallthrough
CT: control target
= control target key end

     0   :  { %8 = vsyncpa [#allocation4], 0  ;;  %s788_s12 = smov [#allocation3]   ;;  %s953_s0 = inlined_call_operand.hbm [shape: f32[2,32,256], index: 0, kind: input, shape index: {}]   ;;  %s954_s1 = inlined_call_operand.vmem [shape: f32[2,32], index: 1, kind: input, shape index: {}]   ;;  %s955_s2 = inlined_call_operand.vmem [shape: f32[32,2], index: 2, kind: input, shape index: {}]   ;;  %s956_s3 = inlined_call_operand.vmem [shape: f32[2,32,1], index: 3, kind: output, shape index: {}]  }
   0x1   :  { %s14_s13 = sshll.u32 %s788_s12, 4  ;;  %s15_s13 = int_to_ptr.vmem [resolvable:$true] %s14_s13 }
   0x2   :  { %s774_s14 = scalar_lea.vmem %s15_s13, 2048  ;;  %p779_p1 = scmp.lt.s32.totalorder %s15_s13, %s15_s13 }
   0x3   :  { %p775_p0 = scmp.ne.s32.totalorder %s15_s13, %s774_s14  ;;  %p780_p2 = scmp.lt.s32.totalorder %s774_s14, %s774_s14 }
   0x5   :  { %p781_p3 = por %p780_p2, %p779_p1 }
   0x7   :  { %p782_p4 = pnand %p781_p3, %p775_p0 }
   0x9   :  { %785 = shalt.err (!%p782_p4)
}
   0xa   :  { %s789_s15 = smov 256   ;;  %s790_s16 = smov 16  }
   0xb   :  { %20 = dma.hbm_to_vmem [thread:$0]  %s953_s0, 2048, %s15_s13, [#allocation4], %s789_s15, %s789_s15, %s790_s16  }
   0xc   :  { %786 = dma.done.wait [#allocation4], 2048  }
   0xd   :  { %787 = vsyncadd [#allocation4], 4294965248  ;;  %vm32_vm0 = vcmask 7168   ;;  %vm41_vm1 = vcmask 15368   ;;  %v791_v0 = vmov 0.0   ;;  %v792_v1 = vmov -inf  }
   0xe   :  { %36 = vst.msk [vmem:[#allocation2 + $0x18] sm:$0xff] %vm32_vm0, %v791_v0  ;;  %33 = vst.msk [vmem:[#allocation2] sm:$0xff] %vm32_vm0, %v791_v0  ;;  %687 = vmatprep.subr.mxu0 %v791_v0  ;;  %v56_v2 = vld [vmem:[#allocation3 + $0x30] sm:$0xff]  ;;  %v57_v3 = vld [vmem:[#allocation3 + $0x38] sm:$0xff]  ;;  %vm793_vm2 = vmmov 0   ;;  %vm200_vm3 = vcmask 261120  }
   0xf   :  { %34 = vst.msk [vmem:[#allocation2 + $0x8] sm:$0xff] %vm32_vm0, %v791_v0  ;;  %35 = vst.msk [vmem:[#allocation2 + $0x10] sm:$0xff] %vm32_vm0, %v791_v0  ;;  %v54_v4 = vld [vmem:[#allocation3 + $0x20] sm:$0xff]  ;;  %v75_v5 = vadd.f32 %v57_v3, %v56_v2  ;;  %v55_v6 = vld [vmem:[#allocation3 + $0x28] sm:$0xff]  ;;  %v99_v14 = vmax.f32 %v56_v2, %v57_v3  ;;  %695 = vmatprep.mubr.msk.f32.mxu0 %vm793_vm2, %v791_v0  ;;  %vm275_vm4 = vcmask 15360   ;;  %vm288_vm5 = vcmask 1041408  }
  0x10   :  { %37 = vst.msk [vmem:[#allocation2 + $0x20] sm:$0xff] %vm32_vm0, %v791_v0  ;;  %38 = vst.msk [vmem:[#allocation2 + $0x28] sm:$0xff] %vm32_vm0, %v791_v0  ;;  %v52_v7 = vld [vmem:[#allocation3 + $0x10] sm:$0xff]  ;;  %v53_v8 = vld [vmem:[#allocation3 + $0x18] sm:$0xff]  ;;  %v72_v12 = vadd.f32 %v55_v6, %v54_v4  ;;  %v96_v15 = vmax.f32 %v54_v4, %v55_v6 }
  0x11   :  { %39 = vst.msk [vmem:[#allocation2 + $0x30] sm:$0xff] %vm32_vm0, %v791_v0  ;;  %40 = vst.msk [vmem:[#allocation2 + $0x38] sm:$0xff] %vm32_vm0, %v791_v0  ;;  %v69_v9 = vadd.f32 %v53_v8, %v52_v7  ;;  %v50_v10 = vld [vmem:[#allocation3] sm:$0xff]  ;;  %v51_v11 = vld [vmem:[#allocation3 + $0x8] sm:$0xff]  ;;  %76 = vadd.xlane.f32.xlu0 %v75_v5  ;;  %v93_v16 = vmax.f32 %v52_v7, %v53_v8 }
  0x12   :  { %45 = vst.msk [vmem:[#allocation2 + $0x18] sm:$0xff] %vm41_vm1, %v792_v1  ;;  %44 = vst.msk [vmem:[#allocation2 + $0x10] sm:$0xff] %vm41_vm1, %v792_v1  ;;  %v66_v13 = vadd.f32 %v51_v11, %v50_v10  ;;  %v90_v17 = vmax.f32 %v50_v10, %v51_v11  ;;  %v64_v18 = vld [vmem:[#allocation3 + $0x70] sm:$0xff]  ;;  %v65_v19 = vld [vmem:[#allocation3 + $0x78] sm:$0xff] }
  0x13   :  { %42 = vst.msk [vmem:[#allocation2] sm:$0xff] %vm41_vm1, %v792_v1  ;;  %43 = vst.msk [vmem:[#allocation2 + $0x8] sm:$0xff] %vm41_vm1, %v792_v1  ;;  %70 = vadd.xlane.f32.xlu1 %v69_v9  ;;  %v62_v20 = vld [vmem:[#allocation3 + $0x60] sm:$0xff]  ;;  %v87_v21 = vadd.f32 %v65_v19, %v64_v18  ;;  %v63_v22 = vld [vmem:[#allocation3 + $0x68] sm:$0xff]  ;;  %v111_v30 = vmax.f32 %v64_v18, %v65_v19 }
  0x14   :  { %46 = vst.msk [vmem:[#allocation2 + $0x20] sm:$0xff] %vm41_vm1, %v792_v1  ;;  %47 = vst.msk [vmem:[#allocation2 + $0x28] sm:$0xff] %vm41_vm1, %v792_v1  ;;  %v60_v23 = vld [vmem:[#allocation3 + $0x50] sm:$0xff]  ;;  %v61_v24 = vld [vmem:[#allocation3 + $0x58] sm:$0xff]  ;;  %v84_v25 = vadd.f32 %v63_v22, %v62_v20  ;;  %v108_v31 = vmax.f32 %v62_v20, %v63_v22 }
  0x15   :  { %48 = vst.msk [vmem:[#allocation2 + $0x30] sm:$0xff] %vm41_vm1, %v792_v1  ;;  %49 = vst.msk [vmem:[#allocation2 + $0x38] sm:$0xff] %vm41_vm1, %v792_v1  ;;  %73 = vadd.xlane.f32.xlu0 %v72_v12  ;;  %v58_v26 = vld [vmem:[#allocation3 + $0x40] sm:$0xff]  ;;  %v59_v27 = vld [vmem:[#allocation3 + $0x48] sm:$0xff]  ;;  %v81_v28 = vadd.f32 %v61_v24, %v60_v23  ;;  %v105_v32 = vmax.f32 %v60_v23, %v61_v24 }
  0x16   :  { %v78_v29 = vadd.f32 %v59_v27, %v58_v26  ;;  %v102_v33 = vmax.f32 %v58_v26, %v59_v27  ;;  %v862_v7 = vld [vmem:[%s954_s1] sm:$0x3] }
  0x17   :  { %67 = vadd.xlane.f32.xlu1 %v66_v13 }
  0x19   :  { %100 = vmax.xlane.f32.xlu0 %v99_v14  ;;  %v117_v34 = vld [vmem:[#allocation2 + $0x18] sm:$0xff]  ;;  %v116_v39 = vld [vmem:[#allocation2 + $0x10] sm:$0xff] }
  0x1a   :  { %v115_v35 = vld [vmem:[#allocation2 + $0x8] sm:$0xff]  ;;  %v114_v41 = vld [vmem:[#allocation2] sm:$0xff] }
  0x1b   :  { %97 = vmax.xlane.f32.xlu1 %v96_v15  ;;  %v119_v14 = vld [vmem:[#allocation2 + $0x28] sm:$0xff]  ;;  %v118_v15 = vld [vmem:[#allocation2 + $0x20] sm:$0xff] }
  0x1c   :  { %v121_v8 = vld [vmem:[#allocation2 + $0x38] sm:$0xff]  ;;  %v120_v9 = vld [vmem:[#allocation2 + $0x30] sm:$0xff] }
  0x1d   :  { %94 = vmax.xlane.f32.xlu0 %v93_v16 }
  0x1f   :  { %91 = vmax.xlane.f32.xlu1 %v90_v17 }
  0x21   :  { %88 = vadd.xlane.f32.xlu0 %v87_v21 }
  0x23   :  { %85 = vadd.xlane.f32.xlu1 %v84_v25 }
  0x25   :  { %82 = vadd.xlane.f32.xlu0 %v81_v28 }
  0x27   :  { %79 = vadd.xlane.f32.xlu1 %v78_v29 }
  0x29   :  { %112 = vmax.xlane.f32.xlu0 %v111_v30 }
  0x2b   :  { %109 = vmax.xlane.f32.xlu1 %v108_v31 }
  0x2d   :  { %106 = vmax.xlane.f32.xlu0 %v105_v32 }
  0x2f   :  { %103 = vmax.xlane.f32.xlu1 %v102_v33 }
  0x9a   :  { %v77_v36 = vpop.xlane.xlu0 %76 }
  0x9b   :  { %v125_v37 = vadd.f32 %v117_v34, %v77_v36 }
  0x9c   :  { %v71_v38 = vpop.xlane.xlu1 %70 }
  0x9d   :  { %v123_v40 = vadd.f32 %v115_v35, %v71_v38  ;;  %134 = vst.msk [vmem:[#allocation2 + $0x18] sm:$0xff] %vm32_vm0, %v125_v37 }
  0x9e   :  { %v74_v42 = vpop.xlane.xlu0 %73 }
  0x9f   :  { %132 = vst.msk [vmem:[#allocation2 + $0x8] sm:$0xff] %vm32_vm0, %v123_v40  ;;  %v124_v43 = vadd.f32 %v116_v39, %v74_v42  ;;  %v192_v40 = vld [vmem:[%s955_s2] sm:$0xff] }
  0xa0   :  { %v68_v44 = vpop.xlane.xlu1 %67  ;;  %700 = vmatprep.mubr.msk.f32.mxu1 %vm275_vm4, %v192_v40 }
  0xa1   :  { %v122_v45 = vadd.f32 %v114_v41, %v68_v44  ;;  %133 = vst.msk [vmem:[#allocation2 + $0x10] sm:$0xff] %vm32_vm0, %v124_v43  ;;  %v193_v44 = vld [vmem:[%s955_s2 + $0x8] sm:$0xff] }
  0xa2   :  { %v101_v46 = vpop.xlane.xlu0 %100 }
  0xa3   :  { %131 = vst.msk [vmem:[#allocation2] sm:$0xff] %vm32_vm0, %v122_v45 }
  0xa4   :  { %v98_v47 = vpop.xlane.xlu1 %97  ;;  %v142_v48 = vld [vmem:[#allocation2 + $0x18] sm:$0xff] }
  0xa5   :  { %v150_v49 = vmax.f32 %v142_v48, %v101_v46  ;;  %v194_v46 = vld [vmem:[%s955_s2 + $0x10] sm:$0xff]  ;;  %v195_v48 = vld [vmem:[%s955_s2 + $0x18] sm:$0xff]  ;;  %s794_s2 = smov 127  }
  0xa6   :  { %v140_v50 = vld [vmem:[#allocation2 + $0x8] sm:$0xff]  ;;  %v95_v51 = vpop.xlane.xlu0 %94 }
  0xa7   :  { %159 = vst.msk [vmem:[#allocation2 + $0x18] sm:$0xff] %vm41_vm1, %v150_v49  ;;  %v148_v52 = vmax.f32 %v140_v50, %v95_v51 }
  0xa8   :  { %v92_v53 = vpop.xlane.xlu1 %91  ;;  %v141_v54 = vld [vmem:[#allocation2 + $0x10] sm:$0xff] }
  0xa9   :  { %157 = vst.msk [vmem:[#allocation2 + $0x8] sm:$0xff] %vm41_vm1, %v148_v52  ;;  %v149_v55 = vmax.f32 %v141_v54, %v98_v47 }
  0xaa   :  { %v139_v56 = vld [vmem:[#allocation2] sm:$0xff]  ;;  %v89_v10 = vpop.xlane.xlu0 %88 }
  0xab   :  { %v147_v57 = vmax.f32 %v139_v56, %v92_v53  ;;  %158 = vst.msk [vmem:[#allocation2 + $0x10] sm:$0xff] %vm41_vm1, %v149_v55  ;;  %v129_v11 = vadd.f32 %v121_v8, %v89_v10 }
  0xac   :  { %v86_v12 = vpop.xlane.xlu1 %85 }
  0xad   :  { %156 = vst.msk [vmem:[#allocation2] sm:$0xff] %vm41_vm1, %v147_v57  ;;  %v128_v13 = vadd.f32 %v120_v9, %v86_v12 }
  0xae   :  { %v170_v58 = vld [vmem:[#allocation2 + $0x18] sm:$0xff]  ;;  %138 = vst.msk [vmem:[#allocation2 + $0x38] sm:$0xff] %vm32_vm0, %v129_v11  ;;  %v83_v16 = vpop.xlane.xlu0 %82 }
  0xaf   :  { %v178_v59 = vmul.f32 0.00390625, %v170_v58  ;;  %137 = vst.msk [vmem:[#allocation2 + $0x30] sm:$0xff] %vm32_vm0, %v128_v13  ;;  %v127_v17 = vadd.f32 %v119_v14, %v83_v16 }
  0xb0   :  { %v168_v60 = vld [vmem:[#allocation2 + $0x8] sm:$0xff]  ;;  %v80_v18 = vpop.xlane.xlu1 %79 }
  0xb1   :  { %186 = vst.msk [vmem:[#allocation2 + $0x18] sm:$0xff] %vm32_vm0, %v178_v59  ;;  %v176_v61 = vmul.f32 0.00390625, %v168_v60  ;;  %v126_v19 = vadd.f32 %v118_v15, %v80_v18  ;;  %136 = vst.msk [vmem:[#allocation2 + $0x28] sm:$0xff] %vm32_vm0, %v127_v17 }
  0xb2   :  { %v169_v62 = vld [vmem:[#allocation2 + $0x10] sm:$0xff]  ;;  %v113_v20 = vpop.xlane.xlu0 %112 }
  0xb3   :  { %184 = vst.msk [vmem:[#allocation2 + $0x8] sm:$0xff] %vm32_vm0, %v176_v61  ;;  %v177_v63 = vmul.f32 0.00390625, %v169_v62  ;;  %135 = vst.msk [vmem:[#allocation2 + $0x20] sm:$0xff] %vm32_vm0, %v126_v19 }
  0xb4   :  { %v167_v1 = vld [vmem:[#allocation2] sm:$0xff]  ;;  %v110_v21 = vpop.xlane.xlu1 %109 }
  0xb5   :  { %v175_v2 = vmul.f32 0.00390625, %v167_v1  ;;  %185 = vst.msk [vmem:[#allocation2 + $0x10] sm:$0xff] %vm32_vm0, %v177_v63  ;;  %v146_v22 = vld [vmem:[#allocation2 + $0x38] sm:$0xff] }
  0xb6   :  { %v154_v23 = vmax.f32 %v146_v22, %v113_v20  ;;  %v145_v24 = vld [vmem:[#allocation2 + $0x30] sm:$0xff]  ;;  %v107_v26 = vpop.xlane.xlu0 %106 }
  0xb7   :  { %183 = vst.msk [vmem:[#allocation2] sm:$0xff] %vm32_vm0, %v175_v2  ;;  %v153_v25 = vmax.f32 %v145_v24, %v110_v21 }
  0xb8   :  { %v199_v3 = vld [vmem:[#allocation2 + $0x18] sm:$0xff]  ;;  %163 = vst.msk [vmem:[#allocation2 + $0x38] sm:$0xff] %vm41_vm1, %v154_v23  ;;  %v104_v27 = vpop.xlane.xlu1 %103  ;;  %v144_v28 = vld [vmem:[#allocation2 + $0x28] sm:$0xff] }
  0xb9   :  { %688 = vmatpush3.msra.mxu0 %v199_v3  ;;  %162 = vst.msk [vmem:[#allocation2 + $0x30] sm:$0xff] %vm41_vm1, %v153_v25  ;;  %v152_v29 = vmax.f32 %v144_v28, %v107_v26 }
  0xba   :  { %689 = vmatprep.subr.mxu0 %v791_v0  ;;  %v197_v5 = vld [vmem:[#allocation2 + $0x8] sm:$0xff]  ;;  %v143_v30 = vld [vmem:[#allocation2 + $0x20] sm:$0xff] }
  0xbb   :  { %v151_v31 = vmax.f32 %v143_v30, %v104_v27  ;;  %161 = vst.msk [vmem:[#allocation2 + $0x28] sm:$0xff] %vm41_vm1, %v152_v29 }
  0xbc   :  { %v198_v4 = vld [vmem:[#allocation2 + $0x10] sm:$0xff] }
  0xbd   :  { %690 = vmatpush3.msra.mxu0 %v198_v4  ;;  %160 = vst.msk [vmem:[#allocation2 + $0x20] sm:$0xff] %vm41_vm1, %v151_v31 }
  0xbe   :  { %691 = vmatprep.subr.mxu0 %v791_v0  ;;  %v196_v6 = vld [vmem:[#allocation2] sm:$0xff] }
  0xbf   :  { %692 = vmatpush3.msra.mxu0 %v197_v5  ;;  %v174_v32 = vld [vmem:[#allocation2 + $0x38] sm:$0xff] }
  0xc0   :  { %693 = vmatprep.subr.mxu0 %v791_v0  ;;  %v182_v33 = vmul.f32 0.00390625, %v174_v32  ;;  %v173_v34 = vld [vmem:[#allocation2 + $0x30] sm:$0xff] }
  0xc1   :  { %694 = vmatpush3.msra.mxu0 %v196_v6  ;;  %v181_v35 = vmul.f32 0.00390625, %v173_v34 }
  0xc2   :  { %696 = vmatmul.mubr.msk.f32.vlgmr.msra.gmra.mxu0 %vm200_vm3, %v862_v7  ;;  %190 = vst.msk [vmem:[#allocation2 + $0x38] sm:$0xff] %vm32_vm0, %v182_v33  ;;  %v172_v36 = vld [vmem:[#allocation2 + $0x28] sm:$0xff] }
  0xc3   :  { %189 = vst.msk [vmem:[#allocation2 + $0x30] sm:$0xff] %vm32_vm0, %v181_v35  ;;  %v180_v37 = vmul.f32 0.00390625, %v172_v36  ;;  %719 = vmatprep.mubr.msk.f32.mxu0 %vm275_vm4, %v192_v40 }
  0xc4   :  { %v171_v38 = vld [vmem:[#allocation2 + $0x20] sm:$0xff] }
  0xc5   :  { %v179_v39 = vmul.f32 0.00390625, %v171_v38  ;;  %188 = vst.msk [vmem:[#allocation2 + $0x28] sm:$0xff] %vm32_vm0, %v180_v37 }
  0xc7   :  { %187 = vst.msk [vmem:[#allocation2 + $0x20] sm:$0xff] %vm32_vm0, %v179_v39 }
  0xc9   :  { %v429_v45 = vld [vmem:[#allocation2 + $0x38] sm:$0xff] }
  0xca   :  { %v428_v47 = vld [vmem:[#allocation2 + $0x30] sm:$0xff] }
  0xcc   :  { %v427_v49 = vld [vmem:[#allocation2 + $0x28] sm:$0xff] }
  0xce   :  { %v426_v50 = vld [vmem:[#allocation2 + $0x20] sm:$0xff] }
 0x182   :  { %v270_v41 = vpop.f32.mrf.mxu0 }
 0x183   :  { %v274_v42 = vmax.f32 %v270_v41, 0.0 }
 0x184   :  { %v697_v43 = vpop.f32.mrf.mxu0 }
 0x185   :  { %698 = vmatprep.subr.msk.mxu1 %vm288_vm5, %v274_v42 }
 0x186   :  { %699 = vmatpush3.msk.msra.mxu1 %vm288_vm5, %v274_v42 }
 0x187   :  { %701 = vmatmul.mubr.msk.f32.vlgmr.msra.gmra.mxu1 %vm275_vm4, %v193_v44  ;;  %706 = vmatprep.subr.mxu1 %v791_v0 }
 0x188   :  { %707 = vmatpush3.msra.mxu1 %v429_v45  ;;  %703 = vmatprep.mubr.msk.f32.mxu1 %vm275_vm4, %v194_v46 }
 0x189   :  { %708 = vmatprep.subr.mxu1 %v791_v0 }
 0x18a   :  { %709 = vmatpush3.msra.mxu1 %v428_v47 }
 0x18b   :  { %704 = vmatmul.mubr.msk.f32.gmra.mxu1 %vm275_vm4, %v195_v48  ;;  %710 = vmatprep.subr.mxu1 %v791_v0 }
 0x18c   :  { %711 = vmatpush3.msra.mxu1 %v427_v49  ;;  %714 = vmatprep.mubr.msk.f32.mxu1 %vm793_vm2, %v791_v0 }
 0x18d   :  { %712 = vmatprep.subr.mxu1 %v791_v0 }
 0x18e   :  { %713 = vmatpush3.msra.mxu1 %v426_v50 }
 0x18f   :  { %715 = vmatmul.mubr.msk.f32.vlgmr.msra.gmra.mxu1 %vm200_vm3, %v862_v7 }
 0x190   :  { %722 = vmatprep.mubr.msk.f32.mxu1 %vm275_vm4, %v194_v46 }
 0x247   :  { %v702_v51 = vpop.f32.mrf.mxu1 }
 0x248   :  { %383 = vrot.lane.b32.xlu1 %v702_v51, %s794_s2 }
 0x249   :  { %v358_v52 = vpop.f32.mrf.mxu1 }
 0x24a   :  { %381 = vrot.lane.b32.xlu0 %v358_v52, %s794_s2 }
 0x24b   :  { %v705_v53 = vpop.f32.mrf.mxu1 }
 0x24c   :  { %387 = vrot.lane.b32.xlu1 %v705_v53, %s794_s2 }
 0x24d   :  { %v368_v54 = vpop.f32.mrf.mxu1 }
 0x24f   :  { %v496_v55 = vpop.f32.mrf.mxu1 }
 0x250   :  { %v500_v56 = vmax.f32 %v496_v55, 0.0  ;;  %385 = vrot.lane.b32.xlu1 %v368_v54, %s794_s2 }
 0x251   :  { %v716_v0 = vpop.f32.mrf.mxu1 }
 0x252   :  { %717 = vmatprep.subr.msk.mxu0 %vm288_vm5, %v500_v56  ;;  %725 = vmatprep.subr.msk.mxu1 %vm288_vm5, %v500_v56 }
 0x253   :  { %718 = vmatpush3.msk.msra.mxu0 %vm288_vm5, %v500_v56  ;;  %726 = vmatpush3.msk.msra.mxu1 %vm288_vm5, %v500_v56 }
 0x254   :  { %720 = vmatmul.mubr.msk.f32.vlgmr.msra.gmra.mxu0 %vm275_vm4, %v193_v44  ;;  %723 = vmatmul.mubr.msk.f32.vlgmr.msra.gmra.mxu1 %vm275_vm4, %v195_v48 }
 0x2ba   :  { %v384_v57 = vpop.permute.xlu1 %383 }
 0x2bb   :  { %v394_v58 = vadd.f32 %v702_v51, %v384_v57 }
 0x2bc   :  { %v382_v59 = vpop.permute.xlu0 %381 }
 0x2bd   :  { %v650_v60 = vmul.f32 -1.442695, %v394_v58  ;;  %v393_v61 = vadd.f32 %v382_v59, %v358_v52 }
 0x2be   :  { %v388_v62 = vpop.permute.xlu1 %387 }
 0x2bf   :  { %734 = vpow2.f32 %v650_v60  ;;  %v649_v63 = vmul.f32 -1.442695, %v393_v61  ;;  %v396_v1 = vadd.f32 %v705_v53, %v388_v62 }
 0x2c1   :  { %736 = vpow2.f32 %v649_v63  ;;  %v652_v2 = vmul.f32 -1.442695, %v396_v1 }
 0x2c2   :  { %v386_v3 = vpop.permute.xlu1 %385 }
 0x2c3   :  { %738 = vpow2.f32 %v652_v2  ;;  %v395_v4 = vadd.f32 %v386_v3, %v368_v54 }
 0x2c5   :  { %v651_v5 = vmul.f32 -1.442695, %v395_v4 }
 0x2c7   :  { %740 = vpow2.f32 %v651_v5 }
 0x2cc   :  { %v735_v6 = vpop.eup %734 }
 0x2cd   :  { %v410_v7 = vadd.f32 1.0, %v735_v6 }
 0x2ce   :  { %v737_v8 = vpop.eup %736 }
 0x2cf   :  { %742 = vrcp.f32 %v410_v7  ;;  %v409_v9 = vadd.f32 1.0, %v737_v8 }
 0x2d0   :  { %v739_v10 = vpop.eup %738 }
 0x2d1   :  { %744 = vrcp.f32 %v409_v9  ;;  %v412_v11 = vadd.f32 1.0, %v739_v10 }
 0x2d3   :  { %746 = vrcp.f32 %v412_v11 }
 0x2d4   :  { %v741_v12 = vpop.eup %740 }
 0x2d5   :  { %v411_v13 = vadd.f32 1.0, %v741_v12 }
 0x2d7   :  { %748 = vrcp.f32 %v411_v13 }
 0x2dc   :  { %v743_v14 = vpop.eup %742 }
 0x2dd   :  { %422 = vst.msk [vmem:[%s956_s3 + $0x8] sm:$0xff] %vm32_vm0, %v743_v14 }
 0x2de   :  { %v745_v15 = vpop.eup %744 }
 0x2df   :  { %421 = vst.msk [vmem:[%s956_s3] sm:$0xff] %vm32_vm0, %v745_v15 }
 0x2e0   :  { %v747_v16 = vpop.eup %746 }
 0x2e1   :  { %424 = vst.msk [vmem:[%s956_s3 + $0x18] sm:$0xff] %vm32_vm0, %v747_v16 }
 0x2e4   :  { %v749_v17 = vpop.eup %748 }
 0x2e5   :  { %423 = vst.msk [vmem:[%s956_s3 + $0x10] sm:$0xff] %vm32_vm0, %v749_v17 }
 0x314   :  { %v721_v18 = vpop.f32.mrf.mxu0  ;;  %v724_v20 = vpop.f32.mrf.mxu1 }
 0x315   :  { %595 = vrot.lane.b32.xlu1 %v721_v18, %s794_s2 }
 0x316   :  { %v570_v19 = vpop.f32.mrf.mxu0  ;;  %v580_v21 = vpop.f32.mrf.mxu1 }
 0x317   :  { %593 = vrot.lane.b32.xlu0 %v570_v19, %s794_s2 }
 0x319   :  { %599 = vrot.lane.b32.xlu1 %v724_v20, %s794_s2 }
 0x31b   :  { %597 = vrot.lane.b32.xlu0 %v580_v21, %s794_s2 }
 0x387   :  { %v596_v22 = vpop.permute.xlu1 %595 }
 0x388   :  { %v606_v23 = vadd.f32 %v721_v18, %v596_v22 }
 0x389   :  { %v594_v24 = vpop.permute.xlu0 %593 }
 0x38a   :  { %v660_v25 = vmul.f32 -1.442695, %v606_v23  ;;  %v605_v26 = vadd.f32 %v594_v24, %v570_v19 }
 0x38b   :  { %v600_v27 = vpop.permute.xlu1 %599 }
 0x38c   :  { %750 = vpow2.f32 %v660_v25  ;;  %v659_v28 = vmul.f32 -1.442695, %v605_v26  ;;  %v608_v29 = vadd.f32 %v724_v20, %v600_v27 }
 0x38d   :  { %v598_v30 = vpop.permute.xlu0 %597 }
 0x38e   :  { %752 = vpow2.f32 %v659_v28  ;;  %v662_v31 = vmul.f32 -1.442695, %v608_v29  ;;  %v607_v32 = vadd.f32 %v598_v30, %v580_v21 }
 0x390   :  { %754 = vpow2.f32 %v662_v31  ;;  %v661_v33 = vmul.f32 -1.442695, %v607_v32 }
 0x392   :  { %756 = vpow2.f32 %v661_v33 }
 0x399   :  { %v751_v34 = vpop.eup %750 }
 0x39a   :  { %v622_v35 = vadd.f32 1.0, %v751_v34 }
 0x39b   :  { %v753_v36 = vpop.eup %752 }
 0x39c   :  { %758 = vrcp.f32 %v622_v35  ;;  %v621_v37 = vadd.f32 1.0, %v753_v36 }
 0x39d   :  { %v755_v38 = vpop.eup %754 }
 0x39e   :  { %760 = vrcp.f32 %v621_v37  ;;  %v624_v39 = vadd.f32 1.0, %v755_v38 }
 0x39f   :  { %v757_v40 = vpop.eup %756 }
 0x3a0   :  { %762 = vrcp.f32 %v624_v39  ;;  %v623_v41 = vadd.f32 1.0, %v757_v40 }
 0x3a2   :  { %764 = vrcp.f32 %v623_v41 }
 0x3a9   :  { %v759_v42 = vpop.eup %758 }
 0x3aa   :  { %664 = vst.msk [vmem:[%s956_s3 + $0x28] sm:$0xff] %vm32_vm0, %v759_v42 }
 0x3ab   :  { %v761_v43 = vpop.eup %760 }
 0x3ac   :  { %663 = vst.msk [vmem:[%s956_s3 + $0x20] sm:$0xff] %vm32_vm0, %v761_v43 }
 0x3ad   :  { %v763_v44 = vpop.eup %762 }
 0x3ae   :  { %666 = vst.msk [vmem:[%s956_s3 + $0x38] sm:$0xff] %vm32_vm0, %v763_v44 }
 0x3af   :  { %v765_v45 = vpop.eup %764 }
 0x3b0   :  { %665 = vst.msk [vmem:[%s956_s3 + $0x30] sm:$0xff] %vm32_vm0, %v765_v45 }
 0x3b1   :  { %642 = vsyncpa [#allocation4], 1 }

</bundles_post_ra>
